<compile_context>
chip_gen: v6e
topology: v6e:2x2x1
jax: 0.10.0
libtpu: 0.0.40
codegen_flags: <defaults>
</compile_context>

<pallas_src>
import functools

import jax
import jax.numpy as jnp
from jax.experimental import pallas as pl
from jax.experimental.pallas import tpu as pltpu

LANE = 128            # lane-dense slab width
MAX_BLOCK_ROWS = 2048 # 2048 x 128 f32 = 1 MiB per input tile
NSPLIT = 2            # leading 'parallel' grid axis (2 TensorCores on v7x)


def _focal_elementwise(x, t, gamma, alpha):
    """Per-element focal loss in f32. Shared by kernel, ragged tail, and ref."""
    # binary_cross_entropy_with_logits (reduction='none'), numerically stable:
    #   bce = max(x, 0) - x * t + log1p(exp(-|x|))
    bce = jnp.maximum(x, 0.0) - x * t + jnp.log1p(jnp.exp(-jnp.abs(x)))
    logpt = -bce
    pt = jnp.exp(logpt)
    one_m_pt = 1.0 - pt
    if float(gamma) == float(int(gamma)) and 0 <= int(gamma) <= 8:
        # Integer gamma (default 2.0): multiply chain, no pow -> no extra
        # exp/log pair on the EUP, and no pow(0, g) edge-case dependence.
        focal = jnp.ones_like(one_m_pt)
        for _ in range(int(gamma)):
            focal = focal * one_m_pt
    else:
        focal = one_m_pt ** gamma
    loss = -focal * logpt
    if alpha is not None:
        loss = loss * (alpha * t + (1.0 - alpha) * (1.0 - t))
    return loss


def _focal_kernel(x_ref, t_ref, out_ref, acc_ref, *, gamma, alpha):
    """One (block_rows, 128) tile: elementwise focal loss into a VMEM accumulator."""
    k = pl.program_id(1)

    @pl.when(k == 0)
    def _():
        acc_ref[...] = jnp.zeros_like(acc_ref)

    x = x_ref[...].astype(jnp.float32)
    t = t_ref[...].astype(jnp.float32)
    acc_ref[...] += _focal_elementwise(x, t, gamma, alpha)

    @pl.when(k == pl.num_programs(1) - 1)
    def _():
        # Single sublane reduce at the very end; lane-dense (1, 128) partial.
        out_ref[...] = jnp.sum(acc_ref[...], axis=0, keepdims=True)


def focal_loss(outputs, targets, gamma=2.0, alpha=0.25, reduction="mean"):
    """Pallas-TPU focal loss matching xv.nn.losses.FocalLoss.forward."""
    x = outputs.reshape(-1)   # native dtype; upcast happens in-kernel
    t = targets.reshape(-1)
    n = x.shape[0]
    if t.shape[0] != n:
        raise ValueError("outputs and targets must have the same number of elements")

    rows_total = n // LANE
    block_rows = min(MAX_BLOCK_ROWS, (rows_total // 8) * 8)

    total = jnp.float32(0.0)
    prefix = 0

    if block_rows >= 8:
        blocks_total = rows_total // block_rows
        nsplit = NSPLIT if blocks_total >= NSPLIT else 1
        steps = blocks_total // nsplit
        prefix_rows = nsplit * steps * block_rows
        prefix = prefix_rows * LANE

        # Contiguous prefix -> slice+reshape is cheap (no full-array pad copy).
        x2 = x[:prefix].reshape(prefix_rows, LANE)
        t2 = t[:prefix].reshape(prefix_rows, LANE)

        kernel = functools.partial(_focal_kernel, gamma=gamma, alpha=alpha)
        in_spec = pl.BlockSpec(
            (block_rows, LANE), lambda i, k: (i * steps + k, 0)
        )

        partials = pl.pallas_call(
            kernel,
            out_shape=jax.ShapeDtypeStruct((nsplit, LANE), jnp.float32),
            grid_spec=pltpu.PrefetchScalarGridSpec(
                num_scalar_prefetch=0,
                grid=(nsplit, steps),
                in_specs=[in_spec, in_spec],
                out_specs=pl.BlockSpec((1, LANE), lambda i, k: (i, 0)),
                scratch_shapes=[pltpu.VMEM((block_rows, LANE), jnp.float32)],
            ),
            compiler_params=pltpu.CompilerParams(
                dimension_semantics=("parallel", "arbitrary"),
            ),
        )(x2, t2)
        total = total + jnp.sum(partials)

    if prefix < n:
        # Ragged tail (< one grid's worth of elements): plain JAX, no mask, no pad.
        xt = x[prefix:].astype(jnp.float32)
        tt = t[prefix:].astype(jnp.float32)
        total = total + jnp.sum(_focal_elementwise(xt, tt, gamma, alpha))

    if reduction == "mean":
        return total / jnp.float32(n)
    if reduction == "sum":
        return total
    # TODO(synk): 'batchwise_mean' (sum over dim 0 only) needs per-batch partial
    # accumulators; only 'mean'/'sum' scalar reductions are implemented.
    raise NotImplementedError(f"reduction={reduction!r} not supported")


def _focal_loss_ref(outputs, targets, gamma=2.0, alpha=0.25):
    """Independent pure-JAX reference (softplus formulation of BCE-with-logits)."""
    x = outputs.astype(jnp.float32)
    t = targets.astype(jnp.float32)
    bce = jax.nn.softplus(x) - x * t
    logpt = -bce
    pt = jnp.exp(logpt)
    loss = -((1.0 - pt) ** gamma) * logpt
    if alpha is not None:
        loss = loss * (alpha * t + (1.0 - alpha) * (1.0 - t))
    return loss.mean()


if __name__ == "__main__":
    key = jax.random.PRNGKey(0)
    k1, k2 = jax.random.split(key)
    # NCHW logits and binary targets, matching the PyTorch module's usage.
    outputs = jax.random.normal(k1, (2, 4, 16, 16), dtype=jnp.float32)
    targets = (jax.random.uniform(k2, (2, 4, 16, 16)) > 0.5).astype(jnp.float32)

    loss = focal_loss(outputs, targets, gamma=2.0, alpha=0.25, reduction="mean")
    loss = jax.block_until_ready(loss)

    ref = _focal_loss_ref(outputs, targets)
    assert jnp.allclose(loss, ref, rtol=1e-5, atol=1e-6), (loss, ref)
    print("KERNEL_OK")
</pallas_src>

<mosaic_0001>
module attributes {stable_mosaic.version = 11 : i64} {
  func.func @_focal_kernel(%arg0: i32, %arg1: i32, %arg2: memref<16x128xf32, #tpu.memory_space<vmem>>, %arg3: memref<16x128xf32, #tpu.memory_space<vmem>>, %arg4: memref<1x128xf32, #tpu.memory_space<vmem>>, %arg5: memref<16x128xf32, #tpu.memory_space<vmem>>) attributes {dimension_semantics = [#tpu.dimension_semantics<parallel>, #tpu.dimension_semantics<arbitrary>], iteration_bounds = array<i64: 1, 1>, scalar_prefetch = 0 : i64, scratch_operands = 1 : i64, tpu.core_type = #tpu.core_type<tc>, window_params = [{transform_indices = @transform_0, window_bounds = array<i64: 16, 128>}, {transform_indices = @transform_1, window_bounds = array<i64: 16, 128>}, {transform_indices = @transform_2, window_bounds = array<i64: 1, 128>}]} {
    %c0_i32 = arith.constant 0 : i32
    %0 = arith.cmpi eq, %arg1, %c0_i32 : i32
    %1 = arith.extui %0 : i1 to i32
    %c0_i32_0 = arith.constant 0 : i32
    %2 = arith.cmpi ne, %1, %c0_i32_0 : i32
    scf.if %2 {
      %cst_18 = arith.constant 0.000000e+00 : f32
      %40 = vector.broadcast %cst_18 : f32 to vector<16x128xf32>
      %c0_19 = arith.constant 0 : index
      %c0_20 = arith.constant 0 : index
      %41 = vector.load %arg5[%c0_19, %c0_20] : memref<16x128xf32, #tpu.memory_space<vmem>>, vector<16x128xf32>
      tpu.vector_store %arg5[%c0_19, %c0_20], %40 {strides = array<i32>} : memref<16x128xf32, #tpu.memory_space<vmem>>, vector<16x128xf32>,
    } else {
    }
    %c0 = arith.constant 0 : index
    %c0_1 = arith.constant 0 : index
    %3 = vector.load %arg2[%c0, %c0_1] : memref<16x128xf32, #tpu.memory_space<vmem>>, vector<16x128xf32>
    %c0_2 = arith.constant 0 : index
    %c0_3 = arith.constant 0 : index
    %4 = vector.load %arg3[%c0_2, %c0_3] : memref<16x128xf32, #tpu.memory_space<vmem>>, vector<16x128xf32>
    %c0_4 = arith.constant 0 : index
    %c0_5 = arith.constant 0 : index
    %5 = vector.load %arg5[%c0_4, %c0_5] : memref<16x128xf32, #tpu.memory_space<vmem>>, vector<16x128xf32>
    %cst = arith.constant 0.000000e+00 : f32
    %6 = vector.broadcast %cst : f32 to vector<16x128xf32>
    %7 = arith.maximumf %3, %6 : vector<16x128xf32>
    %8 = arith.mulf %3, %4 : vector<16x128xf32>
    %9 = arith.subf %7, %8 : vector<16x128xf32>
    %10 = math.absf %3 : vector<16x128xf32>
    %cst_6 = arith.constant 0.000000e+00 : f32
    %11 = vector.broadcast %cst_6 : f32 to vector<16x128xf32>
    %12 = arith.subf %11, %10 : vector<16x128xf32>
    %13 = math.exp %12 : vector<16x128xf32>
    %14 = math.log1p %13 : vector<16x128xf32>
    %15 = arith.addf %9, %14 : vector<16x128xf32>
    %cst_7 = arith.constant 0.000000e+00 : f32
    %16 = vector.broadcast %cst_7 : f32 to vector<16x128xf32>
    %17 = arith.subf %16, %15 : vector<16x128xf32>
    %18 = math.exp %17 : vector<16x128xf32>
    %cst_8 = arith.constant 1.000000e+00 : f32
    %19 = vector.broadcast %cst_8 : f32 to vector<16x128xf32>
    %20 = arith.subf %19, %18 : vector<16x128xf32>
    %cst_9 = arith.constant 1.000000e+00 : f32
    %21 = vector.broadcast %cst_9 : f32 to vector<16x128xf32>
    %22 = arith.mulf %21, %20 : vector<16x128xf32>
    %23 = arith.mulf %22, %20 : vector<16x128xf32>
    %cst_10 = arith.constant 0.000000e+00 : f32
    %24 = vector.broadcast %cst_10 : f32 to vector<16x128xf32>
    %25 = arith.subf %24, %23 : vector<16x128xf32>
    %26 = arith.mulf %25, %17 : vector<16x128xf32>
    %cst_11 = arith.constant 2.500000e-01 : f32
    %27 = vector.broadcast %cst_11 : f32 to vector<16x128xf32>
    %28 = arith.mulf %27, %4 : vector<16x128xf32>
    %cst_12 = arith.constant 1.000000e+00 : f32
    %29 = vector.broadcast %cst_12 : f32 to vector<16x128xf32>
    %30 = arith.subf %29, %4 : vector<16x128xf32>
    %cst_13 = arith.constant 7.500000e-01 : f32
    %31 = vector.broadcast %cst_13 : f32 to vector<16x128xf32>
    %32 = arith.mulf %31, %30 : vector<16x128xf32>
    %33 = arith.addf %28, %32 : vector<16x128xf32>
    %34 = arith.mulf %26, %33 : vector<16x128xf32>
    %35 = arith.addf %5, %34 : vector<16x128xf32>
    %c0_14 = arith.constant 0 : index
    %c0_15 = arith.constant 0 : index
    %36 = vector.load %arg5[%c0_14, %c0_15] : memref<16x128xf32, #tpu.memory_space<vmem>>, vector<16x128xf32>
    tpu.vector_store %arg5[%c0_14, %c0_15], %35 {strides = array<i32>} : memref<16x128xf32, #tpu.memory_space<vmem>>, vector<16x128xf32>,
    %c0_i32_16 = arith.constant 0 : i32
    %37 = arith.cmpi eq, %arg1, %c0_i32_16 : i32
    %38 = arith.extui %37 : i1 to i32
    %c0_i32_17 = arith.constant 0 : i32
    %39 = arith.cmpi ne, %38, %c0_i32_17 : i32
    scf.if %39 {
      %c0_18 = arith.constant 0 : index
      %c0_19 = arith.constant 0 : index
      %40 = vector.load %arg5[%c0_18, %c0_19] : memref<16x128xf32, #tpu.memory_space<vmem>>, vector<16x128xf32>
      %cst_20 = arith.constant dense<0.000000e+00> : vector<128xf32>
      %41 = vector.multi_reduction <add>, %40, %cst_20 [0] : vector<16x128xf32> to vector<128xf32>
      %42 = vector.shape_cast %41 : vector<128xf32> to vector<1x128xf32>
      %c0_21 = arith.constant 0 : index
      %c0_22 = arith.constant 0 : index
      %43 = vector.load %arg4[%c0_21, %c0_22] : memref<1x128xf32, #tpu.memory_space<vmem>>, vector<1x128xf32>
      tpu.vector_store %arg4[%c0_21, %c0_22], %42 {strides = array<i32>} : memref<1x128xf32, #tpu.memory_space<vmem>>, vector<1x128xf32>,
    } else {
    }
    return
  }
  func.func @transform_0(%arg0: i32, %arg1: i32) -> (i32, i32) {
    %c1_i32 = arith.constant 1 : i32
    %0 = arith.muli %arg0, %c1_i32 : i32
    %1 = arith.addi %0, %arg1 : i32
    %c0_i32 = arith.constant 0 : i32
    %c0_i32_0 = arith.constant 0 : i32
    return %1, %c0_i32 : i32, i32
  }
  func.func @transform_1(%arg0: i32, %arg1: i32) -> (i32, i32) {
    %c1_i32 = arith.constant 1 : i32
    %0 = arith.muli %arg0, %c1_i32 : i32
    %1 = arith.addi %0, %arg1 : i32
    %c0_i32 = arith.constant 0 : i32
    %c0_i32_0 = arith.constant 0 : i32
    return %1, %c0_i32 : i32, i32
  }
  func.func @transform_2(%arg0: i32, %arg1: i32) -> (i32, i32) {
    %c0_i32 = arith.constant 0 : i32
    %c0_i32_0 = arith.constant 0 : i32
    return %arg0, %c0_i32 : i32, i32
  }
}

</mosaic_0001>

<bundles_post_ra>
// kernel: tpu_custom_call.1
= control target key start
LH: loop header
LB: loop body
LE: loop exit
PB: predicated region body
PF: predicated region fallthrough
CT: control target
= control target key end

     0   :  { %7 = vsyncpa [#allocation4], 0  ;;  %s267_s0 = inlined_call_operand.hbm [shape: f32[16,128], index: 0, kind: input, shape index: {}]   ;;  %s268_s1 = inlined_call_operand.hbm [shape: f32[16,128], index: 1, kind: input, shape index: {}]   ;;  %s269_s2 = inlined_call_operand.hbm [shape: f32[1,128], index: 2, kind: output, shape index: {}]  }
   0x1   :  { %8 = vsyncpa [#allocation7], 0 }
   0x2   :  { %9 = vsyncpa [#allocation5], 0  ;;  %s238_s9 = smov [#allocation3]  }
   0x3   :  { %s19_s10 = sshll.u32 %s238_s9, 4  ;;  %s20_s10 = int_to_ptr.vmem [resolvable:$true] %s19_s10 }
   0x4   :  { %s180_s11 = scalar_lea.vmem %s20_s10, 256  ;;  %p185_p1 = scmp.lt.s32.totalorder %s20_s10, %s20_s10 }
   0x5   :  { %p181_p0 = scmp.ne.s32.totalorder %s20_s10, %s180_s11  ;;  %p186_p2 = scmp.lt.s32.totalorder %s180_s11, %s180_s11 }
   0x7   :  { %p187_p3 = por %p186_p2, %p185_p1 }
   0x9   :  { %p188_p4 = pnand %p187_p3, %p181_p0 }
   0xb   :  { %191 = shalt.err (!%p188_p4)
}
   0xc   :  { %s239_s12 = smov 128   ;;  %s240_s13 = smov 8  }
   0xd   :  { %25 = dma.hbm_to_vmem [thread:$0]  %s267_s0, 256, %s20_s10, [#allocation4], %s239_s12, %s239_s12, %s240_s13  }
   0xe   :  { %s241_s16 = smov [#allocation6]  }
   0xf   :  { %s35_s17 = sshll.u32 %s241_s16, 4  ;;  %s36_s17 = int_to_ptr.vmem [resolvable:$true] %s35_s17 }
  0x10   :  { %s200_s18 = scalar_lea.vmem %s36_s17, 256  ;;  %p205_p6 = scmp.lt.s32.totalorder %s36_s17, %s36_s17 }
  0x11   :  { %p201_p5 = scmp.ne.s32.totalorder %s36_s17, %s200_s18  ;;  %p206_p7 = scmp.lt.s32.totalorder %s200_s18, %s200_s18 }
  0x13   :  { %p207_p8 = por %p206_p7, %p205_p6 }
  0x15   :  { %p208_p9 = pnand %p207_p8, %p201_p5 }
  0x17   :  { %211 = shalt.err (!%p208_p9)
}
  0x18   :  { %41 = dma.hbm_to_vmem [thread:$0]  %s268_s1, 256, %s36_s17, [#allocation7], %s239_s12, %s239_s12, %s240_s13  }
  0x19   :  { %232 = dma.done.wait [#allocation4], 256  }
  0x1a   :  { %233 = vsyncadd [#allocation4], 4294967040 }
  0x1b   :  { %234 = dma.done.wait [#allocation7], 256  }
  0x1c   :  { %235 = vsyncadd [#allocation7], 4294967040  ;;  %v58_v0 = vld [vmem:[#allocation3] sm:$0xff]  ;;  %v59_v1 = vld [vmem:[#allocation3 + $0x8] sm:$0xff]  ;;  %s242_s0 = smov [#allocation8]  }
  0x1d   :  { %v70_v2 = vand.u32 2147483647, %v58_v0  ;;  %v71_v3 = vand.u32 2147483647, %v59_v1  ;;  %v60_v14 = vld [vmem:[#allocation6] sm:$0xff]  ;;  %v61_v15 = vld [vmem:[#allocation6 + $0x8] sm:$0xff] }
  0x1e   :  { %v64_v17 = vmax.f32 %v58_v0, 0.0  ;;  %v66_v18 = vmul.f32 %v60_v14, %v58_v0  ;;  %v65_v21 = vmax.f32 %v59_v1, 0.0  ;;  %v67_v22 = vmul.f32 %v61_v15, %v59_v1  ;;  %s145_s1 = sshll.u32 %s242_s0, 4  ;;  %s146_s1 = int_to_ptr.vmem [resolvable:$true] %s145_s1 }
  0x1f   :  { %v72_v4 = vsub.f32 0.0, %v70_v2  ;;  %v73_v5 = vsub.f32 0.0, %v71_v3  ;;  %v114_v40 = vsub.f32 1.0, %v60_v14  ;;  %v115_v41 = vsub.f32 1.0, %v61_v15  ;;  %s212_s21 = scalar_lea.vmem %s146_s1, 16  ;;  %s216_s22 = scalar_lea.vmem %s146_s1, 32 }
  0x20   :  { %v68_v26 = vsub.f32 %v64_v17, %v66_v18  ;;  %v69_v29 = vsub.f32 %v65_v21, %v67_v22  ;;  %v112_v45 = vmul.f32 0.25, %v60_v14  ;;  %v113_v48 = vmul.f32 0.25, %v61_v15  ;;  %p213_p10 = scmp.ne.s32.totalorder %s146_s1, %s212_s21  ;;  %p217_p11 = scmp.lt.s32.totalorder %s146_s1, %s146_s1 }
  0x21   :  { %v74_v6 = vmul.f32 1.442695, %v72_v4  ;;  %v76_v7 = vmul.f32 1.442695, %v73_v5  ;;  %v116_v46 = vmul.f32 0.75, %v114_v40  ;;  %v117_v49 = vmul.f32 0.75, %v115_v41  ;;  %p218_p12 = scmp.lt.s32.totalorder %s216_s22, %s212_s21 }
  0x23   :  { %160 = vpow2.f32 %v74_v6  ;;  %v118_v53 = vadd.f32 %v116_v46, %v112_v45  ;;  %v119_v55 = vadd.f32 %v117_v49, %v113_v48  ;;  %p219_p13 = por %p218_p12, %p217_p11 }
  0x24   :  { %162 = vpow2.f32 %v76_v7 }
  0x25   :  { %p220_p0 = pnand %p219_p13, %p213_p10 }
  0x30   :  { %v161_v8 = vpop.eup %160 }
  0x31   :  { %v163_v9 = vpop.eup %162  ;;  %v78_v10 = vadd.f32 1.0, %v161_v8  ;;  %v81_v12 = vmul.f32 -0.5, %v161_v8  ;;  %v84_v19 = vand.u32 2147483647, %v161_v8 }
  0x32   :  { %v87_v11 = vadd.f32 1.0, %v163_v9  ;;  %v90_v13 = vmul.f32 -0.5, %v163_v9  ;;  %v93_v23 = vand.u32 2147483647, %v163_v9 }
  0x33   :  { %164 = vlog2.f32 %v78_v10  ;;  %v82_v16 = vadd.f32 1.0, %v81_v12  ;;  %vm85_vm0 = vcmp.lt.f32.partialorder %v84_v19, 0.0004427343 }
  0x34   :  { %166 = vlog2.f32 %v87_v11  ;;  %v91_v20 = vadd.f32 1.0, %v90_v13  ;;  %vm94_vm1 = vcmp.lt.f32.partialorder %v93_v23, 0.0004427343 }
  0x35   :  { %v83_v24 = vmul.f32 %v161_v8, %v82_v16 }
  0x36   :  { %v92_v27 = vmul.f32 %v163_v9, %v91_v20 }
  0x40   :  { %v165_v25 = vpop.eup %164 }
  0x41   :  { %v167_v28 = vpop.eup %166  ;;  %v80_v30 = vmul.f32 0.6931472, %v165_v25 }
  0x42   :  { %v89_v31 = vmul.f32 0.6931472, %v167_v28 }
  0x43   :  { %v86_v32 = vsel %vm85_vm0, %v83_v24, %v80_v30 }
  0x44   :  { %v95_v33 = vsel %vm94_vm1, %v92_v27, %v89_v31  ;;  %v96_v34 = vadd.f32 %v86_v32, %v68_v26 }
  0x45   :  { %v97_v35 = vadd.f32 %v95_v33, %v69_v29 }
  0x46   :  { %v98_v36 = vsub.f32 0.0, %v96_v34 }
  0x47   :  { %v99_v37 = vsub.f32 0.0, %v97_v35 }
  0x48   :  { %v100_v38 = vmul.f32 1.442695, %v98_v36 }
  0x49   :  { %v102_v39 = vmul.f32 1.442695, %v99_v37 }
  0x4a   :  { %168 = vpow2.f32 %v100_v38 }
  0x4b   :  { %170 = vpow2.f32 %v102_v39 }
  0x57   :  { %v169_v42 = vpop.eup %168 }
  0x58   :  { %v171_v43 = vpop.eup %170  ;;  %v104_v44 = vsub.f32 1.0, %v169_v42 }
  0x59   :  { %v105_v47 = vsub.f32 1.0, %v171_v43 }
  0x5a   :  { %v106_v50 = vmul.f32 %v104_v44, %v104_v44 }
  0x5b   :  { %v107_v51 = vmul.f32 %v105_v47, %v105_v47 }
  0x5c   :  { %v108_v52 = vsub.f32 0.0, %v106_v50 }
  0x5d   :  { %v109_v54 = vsub.f32 0.0, %v107_v51 }
  0x5e   :  { %v110_v56 = vmul.f32 %v108_v52, %v98_v36 }
  0x5f   :  { %v111_v57 = vmul.f32 %v109_v54, %v99_v37 }
  0x60   :  { %v120_v58 = vmul.f32 %v118_v53, %v110_v56 }
  0x61   :  { %v121_v59 = vmul.f32 %v119_v55, %v111_v57 }
  0x63   :  { %v131_v60 = vadd.f32 %v121_v59, %v120_v58 }
  0x65   :  { %v132_v61 = vrot.slane %v131_v60, 4 }
  0x67   :  { %v133_v62 = vadd.f32 %v132_v61, %v131_v60 }
  0x69   :  { %v134_v63 = vrot.slane %v133_v62, 2 }
  0x6b   :  { %v135_v0 = vadd.f32 %v134_v63, %v133_v62 }
  0x6d   :  { %v136_v1 = vrot.slane %v135_v0, 1 }
  0x6f   :  { %v137_v2 = vadd.f32 %v136_v1, %v135_v0 }
  0x71   :  { %138 = vst [vmem:[#allocation8] sm:$0x1] %v137_v2 }
  0x72   :  { %223 = shalt.err (!%p220_p0)
}
  0x73   :  { %148 = dma.vmem_to_hbm [thread:$0]  %s146_s1, 16, %s269_s2, [#allocation5]  }
  0x74   :  { %236 = dma.done.wait [#allocation5], 16  }
  0x75   :  { %237 = vsyncadd [#allocation5], 4294967280 }
  0x76   :  { %152 = vsyncpa [#allocation4], 1 }
  0x77   :  { %153 = vsyncpa [#allocation7], 1 }
  0x78   :  { %154 = vsyncpa [#allocation5], 1 }

</bundles_post_ra>
